<compile_context>
chip_gen: v7x
topology: tpu7x:2x2x1
jax: 0.10.0
libtpu: 0.0.40
codegen_flags: <defaults>
</compile_context>

<pallas_src>
import jax
import jax.numpy as jnp
from jax.experimental import pallas as pl
from jax.experimental.pallas import tpu as pltpu


# --------------------------------------------------------------------------- #
# Helpers
# --------------------------------------------------------------------------- #
def _band_weight(w_hwio, width):
    """(3,3,Cin,Cout) HWIO conv weight -> (3, (W+2)*Cin, W*Cout) bf16, banded over W.

    wb[dy, (j+dx)*Cin + ci, j*Cout + co] = w[dy, dx, ci, co], zeros elsewhere, so a
    single (M, (W+2)*Cin) x ((W+2)*Cin, W*Cout) dot per dy computes a full conv row.
    """
    kh, kw, cin, cout = w_hwio.shape
    sel = jnp.zeros((kw, width + 2, width), jnp.float32)
    idx = jnp.arange(width)
    for dx in range(kw):
        sel = sel.at[dx, idx + dx, idx].set(1.0)
    wb = jnp.einsum("xsj,yxio->ysijo", sel, w_hwio.astype(jnp.float32))
    return wb.reshape(kh, (width + 2) * cin, width * cout).astype(jnp.bfloat16)


def _pick_batch_tile(n, rows_per_image, target_rows=1024):
    """Images per grid step: aim for ~target_rows matmul rows per step while keeping
    the 'parallel' grid length >= 2 so megacore parts (v7x) can shard it."""
    best = 1
    for bt in range(1, n + 1):
        if n % bt or bt * rows_per_image > target_rows:
            continue
        if n // bt >= 2:
            best = bt
    return best


def _vmem_limit_bytes(block_bytes, scratch_bytes):
    """Scoped-VMEM budget from actual tile sizes (pipeline double-buffers blocks).

    Clamped to [16 MiB, 48 MiB]: big enough to never regress small shapes, small
    enough to stay well inside v7x's 64 MiB physical VMEM; v5e/v6e (128 MiB) simply
    have more headroom."""
    need = 2 * block_bytes + scratch_bytes + (4 << 20)
    return int(min(max(need, 16 << 20), 48 << 20))


# --------------------------------------------------------------------------- #
# Fused stage kernel:
#   [optional BN-affine + ReLU on the input] -> 3x3 conv (stride 1, pad 1)
#   -> per-step BN partial stats (sum / sum-of-squares)
# --------------------------------------------------------------------------- #
def _make_stage_kernel(bt, h, width, cin, cout, apply_input_act):
    kin = (width + 2) * cin

    def kernel(*refs):
        if apply_input_act:
            x_ref, sc_ref, sh_ref, wb_ref, o_ref, st_ref, xpad_ref = refs
        else:
            x_ref, wb_ref, o_ref, st_ref, xpad_ref = refs

        x = x_ref[...]                                     # (bt, h, width*cin) f32
        if apply_input_act:
            # fused BN1-affine + ReLU, lane-packed scale/shift (1, 1, width*cin)
            x = jnp.maximum(x * sc_ref[...] + sh_ref[...], 0.0)

        # zero-padded bf16 activation scratch: halo = the zero fill (single cast)
        xpad_ref[...] = jnp.zeros_like(xpad_ref)
        xpad_ref[:, 1:h + 1, cin:(width + 1) * cin] = x.astype(jnp.bfloat16)

        def row_slab(dy):
            # (bt, h, (width+2)*cin) -> (bt*h, (width+2)*cin): major-dim merge only
            return xpad_ref[:, dy:dy + h, :].reshape(bt * h, kin)

        # 3 contractions (one per kernel row) against the W-banded weight; MXU output
        # is already lane-dense (width*cout lanes).
        acc = jnp.dot(row_slab(0), wb_ref[0], preferred_element_type=jnp.float32)
        for dy in (1, 2):
            acc += jnp.dot(row_slab(dy), wb_ref[dy],
                           preferred_element_type=jnp.float32)

        # single-pass BN partial stats, packed into one (2, width*cout) output
        st_ref[0:1, :] = jnp.sum(acc, axis=0, keepdims=True)
        st_ref[1:2, :] = jnp.sum(acc * acc, axis=0, keepdims=True)

        # lane-dense conv output, no halo, major-dim split only
        o_ref[...] = acc.reshape(bt, h, width * cout)

    return kernel


def conv3x3_bn_stats(x_packed, wband, *, width, cin, cout,
                     bn_scale=None, bn_shift=None):
    """One fused stage on lane-packed rows.

    x_packed: (N, H, W*Cin) f32.
    wband:    (3, (W+2)*Cin, W*Cout) bf16 banded weight.
    bn_scale / bn_shift: (W*Cin,) lane-packed BN1 affine (stage 2) or None (stage 1).
    Returns y (N, H, W*Cout) f32 and stats (steps, 2, W*Cout) f32.
    """
    n, h, wcin = x_packed.shape
    assert wcin == width * cin
    bt = _pick_batch_tile(n, h)
    steps = n // bt
    apply_act = bn_scale is not None
    kernel = _make_stage_kernel(bt, h, width, cin, cout, apply_act)

    in_arrays = [x_packed]
    in_specs = [pl.BlockSpec((bt, h, width * cin), lambda s: (s, 0, 0))]
    if apply_act:
        sc = bn_scale.reshape(1, 1, width * cin).astype(jnp.float32)
        sh = bn_shift.reshape(1, 1, width * cin).astype(jnp.float32)
        in_arrays += [sc, sh]
        in_specs += [pl.BlockSpec((1, 1, width * cin), lambda s: (0, 0, 0)),
                     pl.BlockSpec((1, 1, width * cin), lambda s: (0, 0, 0))]
    in_arrays.append(wband)
    in_specs.append(pl.BlockSpec(wband.shape, lambda s: (0, 0, 0)))

    out_shape = (
        jax.ShapeDtypeStruct((n, h, width * cout), jnp.float32),
        jax.ShapeDtypeStruct((steps, 2, width * cout), jnp.float32),
    )
    out_specs = (
        pl.BlockSpec((bt, h, width * cout), lambda s: (s, 0, 0)),
        pl.BlockSpec((None, 2, width * cout), lambda s: (s, 0, 0)),
    )
    scratch_bytes = bt * (h + 2) * (width + 2) * cin * 2
    scratch_shapes = [pltpu.VMEM((bt, h + 2, (width + 2) * cin), jnp.bfloat16)]

    block_bytes = (bt * h * width * cin * 4            # input block
                   + bt * h * width * cout * 4         # conv output block
                   + 2 * width * cout * 4              # stats block
                   + wband.size * 2                    # banded weight
                   + (2 * width * cin * 4 if apply_act else 0))
    flops = 2 * steps * 3 * (bt * h) * (width + 2) * cin * width * cout
    bytes_accessed = (n * h * width * (cin + cout) * 4 + wband.size * 2
                      + steps * 2 * width * cout * 4)

    y, stats = pl.pallas_call(
        kernel,
        out_shape=out_shape,
        grid=(steps,),
        in_specs=in_specs,
        out_specs=out_specs,
        scratch_shapes=scratch_shapes,
        compiler_params=pltpu.CompilerParams(
            dimension_semantics=("parallel",),
            vmem_limit_bytes=_vmem_limit_bytes(block_bytes, scratch_bytes),
        ),
        cost_estimate=pl.CostEstimate(flops=flops, transcendentals=0,
                                      bytes_accessed=bytes_accessed),
    )(*in_arrays)
    return y, stats


# --------------------------------------------------------------------------- #
# BasicBlock forward (PyTorch training-mode BN semantics, eps = 1e-5)
# --------------------------------------------------------------------------- #
def _bn_scale_shift(stats, count, gamma, beta, eps, width, cout):
    """Finalize training-mode BN from packed per-step partials."""
    s = jnp.sum(stats.reshape(-1, 2, width, cout), axis=(0, 2))   # (2, cout)
    mean = s[0] / count
    # TODO(synk): E[x^2] - mean^2 can cancel catastrophically for large-mean
    # activations at real network depth; switch to a shifted / Welford merge then.
    var = jnp.maximum(s[1] / count - mean * mean, 0.0)
    inv = jax.lax.rsqrt(var + eps)
    scale = gamma * inv
    shift = beta - mean * scale
    return scale, shift


def init_basic_block_params(key, inputs, outputs):
    """Deterministic parameters matching BasicBlock's shapes (HWIO conv weights).

    Conv biases are omitted: under training-mode BatchNorm the batch-mean subtraction
    cancels a per-channel conv bias exactly, so it never affects the block output.
    """
    ks = jax.random.split(key, 6)
    fan1 = inputs * 9
    fan2 = outputs * 9
    return {
        "conv1_w": jax.random.normal(ks[0], (3, 3, inputs, outputs), jnp.float32)
        / jnp.sqrt(fan1),
        "bn1_gamma": 1.0 + 0.1 * jax.random.normal(ks[1], (outputs,), jnp.float32),
        "bn1_beta": 0.1 * jax.random.normal(ks[2], (outputs,), jnp.float32),
        "conv2_w": jax.random.normal(ks[3], (3, 3, outputs, outputs), jnp.float32)
        / jnp.sqrt(fan2),
        "bn2_gamma": 1.0 + 0.1 * jax.random.normal(ks[4], (outputs,), jnp.float32),
        "bn2_beta": 0.1 * jax.random.normal(ks[5], (outputs,), jnp.float32),
    }


def basic_block_forward(x_nchw, params, *, eps=1e-5):
    """BasicBlock forward (NCHW in / NCHW out), stride = 1."""
    x = jnp.transpose(x_nchw, (0, 2, 3, 1)).astype(jnp.float32)      # NCHW -> NHWC
    n, h, w, cin = x.shape
    c1 = params["conv1_w"].shape[-1]
    c2 = params["conv2_w"].shape[-1]
    count = n * h * w

    wb1 = _band_weight(params["conv1_w"], w)
    wb2 = _band_weight(params["conv2_w"], w)

    x_packed = x.reshape(n, h, w * cin)                  # free row-major HBM reshape

    # stage 1: conv1 + BN1 partial stats (zero-padding done inside the kernel)
    y1, st1 = conv3x3_bn_stats(x_packed, wb1, width=w, cin=cin, cout=c1)
    scale1, shift1 = _bn_scale_shift(st1, count, params["bn1_gamma"],
                                     params["bn1_beta"], eps, w, c1)

    # stage 2: fused BN1-affine + ReLU + conv2 + BN2 partial stats
    y2, st2 = conv3x3_bn_stats(y1, wb2, width=w, cin=c1, cout=c2,
                               bn_scale=jnp.tile(scale1, w),
                               bn_shift=jnp.tile(shift1, w))
    scale2, shift2 = _bn_scale_shift(st2, count, params["bn2_gamma"],
                                     params["bn2_beta"], eps, w, c2)

    # final BN2-affine + ReLU as plain XLA elementwise: fuses with the NHWC->NCHW
    # transpose, so no third pallas_call / extra HBM round-trip.
    out = jnp.maximum(y2 * jnp.tile(scale2, w) + jnp.tile(shift2, w), 0.0)
    out = out.reshape(n, h, w, c2)
    return jnp.transpose(out, (0, 3, 1, 2))                          # NHWC -> NCHW


# --------------------------------------------------------------------------- #
# Pure-JAX reference (same training-mode BN semantics) + demo
# --------------------------------------------------------------------------- #
def _stage_reference(x, w_hwio, gamma, beta, eps):
    y = jax.lax.conv_general_dilated(
        x, w_hwio, window_strides=(1, 1), padding=((1, 1), (1, 1)),
        dimension_numbers=("NHWC", "HWIO", "NHWC"))
    mean = jnp.mean(y, axis=(0, 1, 2))
    var = jnp.mean(jnp.square(y - mean), axis=(0, 1, 2))
    y = (y - mean) * jax.lax.rsqrt(var + eps) * gamma + beta
    return jnp.maximum(y, 0.0)


def basic_block_reference(x_nchw, params, eps=1e-5):
    x = jnp.transpose(x_nchw, (0, 2, 3, 1)).astype(jnp.float32)
    y = _stage_reference(x, params["conv1_w"], params["bn1_gamma"],
                         params["bn1_beta"], eps)
    y = _stage_reference(y, params["conv2_w"], params["bn2_gamma"],
                         params["bn2_beta"], eps)
    return jnp.transpose(y, (0, 3, 1, 2))


if __name__ == "__main__":
    key = jax.random.PRNGKey(0)
    k_x, k_p = jax.random.split(key)

    N, C_IN, C_OUT, H, W = 2, 4, 8, 16, 16
    x = jax.random.normal(k_x, (N, C_IN, H, W), jnp.float32)          # NCHW like PyTorch
    params = init_basic_block_params(k_p, C_IN, C_OUT)

    fwd = jax.jit(basic_block_forward)
    out = jax.block_until_ready(fwd(x, params))

    assert out.shape == (N, C_OUT, H, W)
    assert bool(jnp.all(jnp.isfinite(out)))
    assert bool(jnp.all(out >= 0.0))                                  # ReLU output

    ref = jax.block_until_ready(basic_block_reference(x, params))
    max_err = float(jnp.max(jnp.abs(out - ref)))
    assert max_err < 0.15, f"max |pallas - reference| = {max_err}"

    print("KERNEL_OK")
</pallas_src>

<mosaic_0001>
module attributes {stable_mosaic.version = 11 : i64} {
  func.func @kernel(%arg0: i32, %arg1: memref<1x16x64xf32, #tpu.memory_space<vmem>>, %arg2: memref<3x72x128xbf16, #tpu.memory_space<vmem>>, %arg3: memref<1x16x128xf32, #tpu.memory_space<vmem>>, %arg4: memref<1x2x128xf32, #tpu.memory_space<vmem>>, %arg5: memref<1x18x72xbf16, #tpu.memory_space<vmem>>) attributes {dimension_semantics = [#tpu.dimension_semantics<parallel>], iteration_bounds = array<i64: 2>, scalar_prefetch = 0 : i64, scratch_operands = 1 : i64, tpu.core_type = #tpu.core_type<tc>, window_params = [{transform_indices = @transform_0, window_bounds = array<i64: 1, 16, 64>}, {pipeline_mode = #tpu.pipeline_mode<synchronous>, transform_indices = @transform_1, window_bounds = array<i64: 3, 72, 128>}, {transform_indices = @transform_2, window_bounds = array<i64: 1, 16, 128>}, {transform_indices = @transform_3, window_bounds = array<i64: 1, 2, 128>}]} {
    %c0 = arith.constant 0 : index
    %c0_0 = arith.constant 0 : index
    %c0_1 = arith.constant 0 : index
    %0 = vector.load %arg1[%c0, %c0_0, %c0_1] : memref<1x16x64xf32, #tpu.memory_space<vmem>>, vector<1x16x64xf32>
    %cst = arith.constant 0.000000e+00 : bf16
    %1 = vector.broadcast %cst : bf16 to vector<1x18x72xbf16>
    %c0_2 = arith.constant 0 : index
    %c0_3 = arith.constant 0 : index
    %c0_4 = arith.constant 0 : index
    %2 = vector.load %arg5[%c0_2, %c0_3, %c0_4] : memref<1x18x72xbf16, #tpu.memory_space<vmem>>, vector<1x18x72xbf16>
    tpu.vector_store %arg5[%c0_2, %c0_3, %c0_4], %1 {strides = array<i32>} : memref<1x18x72xbf16, #tpu.memory_space<vmem>>, vector<1x18x72xbf16>,
    %3 = arith.truncf %0 : vector<1x16x64xf32> to vector<1x16x64xbf16>
    %c0_5 = arith.constant 0 : index
    %c1 = arith.constant 1 : index
    %c4 = arith.constant 4 : index
    %4 = vector.load %arg5[%c0_5, %c1, %c4] : memref<1x18x72xbf16, #tpu.memory_space<vmem>>, vector<1x16x64xbf16>
    tpu.vector_store %arg5[%c0_5, %c1, %c4], %3 {strides = array<i32>} : memref<1x18x72xbf16, #tpu.memory_space<vmem>>, vector<1x16x64xbf16>,
    %c0_6 = arith.constant 0 : index
    %c0_7 = arith.constant 0 : index
    %c0_8 = arith.constant 0 : index
    %5 = vector.load %arg5[%c0_6, %c0_7, %c0_8] : memref<1x18x72xbf16, #tpu.memory_space<vmem>>, vector<1x16x72xbf16>
    %6 = vector.shape_cast %5 : vector<1x16x72xbf16> to vector<16x72xbf16>
    %c0_9 = arith.constant 0 : index
    %c0_10 = arith.constant 0 : index
    %c0_11 = arith.constant 0 : index
    %7 = vector.load %arg2[%c0_9, %c0_10, %c0_11] : memref<3x72x128xbf16, #tpu.memory_space<vmem>>, vector<1x72x128xbf16>
    %8 = vector.shape_cast %7 : vector<1x72x128xbf16> to vector<72x128xbf16>
    %cst_12 = arith.constant dense<0.000000e+00> : vector<16x128xf32>
    %9 = tpu.matmul %6, %8, %cst_12 {dimension_numbers = #tpu.dot_dimension_numbers<[1], [0], [0], [1], [0, 0, 1, 1], [], []>} : vector<16x72xbf16>, vector<72x128xbf16>, vector<16x128xf32> -> vector<16x128xf32>
    %c0_13 = arith.constant 0 : index
    %c1_14 = arith.constant 1 : index
    %c0_15 = arith.constant 0 : index
    %10 = vector.load %arg5[%c0_13, %c1_14, %c0_15] : memref<1x18x72xbf16, #tpu.memory_space<vmem>>, vector<1x16x72xbf16>
    %11 = vector.shape_cast %10 : vector<1x16x72xbf16> to vector<16x72xbf16>
    %c1_16 = arith.constant 1 : index
    %c0_17 = arith.constant 0 : index
    %c0_18 = arith.constant 0 : index
    %12 = vector.load %arg2[%c1_16, %c0_17, %c0_18] : memref<3x72x128xbf16, #tpu.memory_space<vmem>>, vector<1x72x128xbf16>
    %13 = vector.shape_cast %12 : vector<1x72x128xbf16> to vector<72x128xbf16>
    %cst_19 = arith.constant dense<0.000000e+00> : vector<16x128xf32>
    %14 = tpu.matmul %11, %13, %cst_19 {dimension_numbers = #tpu.dot_dimension_numbers<[1], [0], [0], [1], [0, 0, 1, 1], [], []>} : vector<16x72xbf16>, vector<72x128xbf16>, vector<16x128xf32> -> vector<16x128xf32>
    %15 = arith.addf %9, %14 : vector<16x128xf32>
    %c0_20 = arith.constant 0 : index
    %c2 = arith.constant 2 : index
    %c0_21 = arith.constant 0 : index
    %16 = vector.load %arg5[%c0_20, %c2, %c0_21] : memref<1x18x72xbf16, #tpu.memory_space<vmem>>, vector<1x16x72xbf16>
    %17 = vector.shape_cast %16 : vector<1x16x72xbf16> to vector<16x72xbf16>
    %c2_22 = arith.constant 2 : index
    %c0_23 = arith.constant 0 : index
    %c0_24 = arith.constant 0 : index
    %18 = vector.load %arg2[%c2_22, %c0_23, %c0_24] : memref<3x72x128xbf16, #tpu.memory_space<vmem>>, vector<1x72x128xbf16>
    %19 = vector.shape_cast %18 : vector<1x72x128xbf16> to vector<72x128xbf16>
    %cst_25 = arith.constant dense<0.000000e+00> : vector<16x128xf32>
    %20 = tpu.matmul %17, %19, %cst_25 {dimension_numbers = #tpu.dot_dimension_numbers<[1], [0], [0], [1], [0, 0, 1, 1], [], []>} : vector<16x72xbf16>, vector<72x128xbf16>, vector<16x128xf32> -> vector<16x128xf32>
    %21 = arith.addf %15, %20 : vector<16x128xf32>
    %cst_26 = arith.constant dense<0.000000e+00> : vector<128xf32>
    %22 = vector.multi_reduction <add>, %21, %cst_26 [0] : vector<16x128xf32> to vector<128xf32>
    %23 = vector.shape_cast %22 : vector<128xf32> to vector<1x128xf32>
    %c0_27 = arith.constant 0 : index
    %c0_28 = arith.constant 0 : index
    %c0_29 = arith.constant 0 : index
    %24 = vector.load %arg4[%c0_27, %c0_28, %c0_29] : memref<1x2x128xf32, #tpu.memory_space<vmem>>, vector<1x1x128xf32>
    %25 = vector.shape_cast %24 : vector<1x1x128xf32> to vector<1x128xf32>
    %26 = vector.shape_cast %23 : vector<1x128xf32> to vector<1x1x128xf32>
    tpu.vector_store %arg4[%c0_27, %c0_28, %c0_29], %26 {strides = array<i32>} : memref<1x2x128xf32, #tpu.memory_space<vmem>>, vector<1x1x128xf32>,
    %27 = arith.mulf %21, %21 : vector<16x128xf32>
    %cst_30 = arith.constant dense<0.000000e+00> : vector<128xf32>
    %28 = vector.multi_reduction <add>, %27, %cst_30 [0] : vector<16x128xf32> to vector<128xf32>
    %29 = vector.shape_cast %28 : vector<128xf32> to vector<1x128xf32>
    %c0_31 = arith.constant 0 : index
    %c1_32 = arith.constant 1 : index
    %c0_33 = arith.constant 0 : index
    %30 = vector.load %arg4[%c0_31, %c1_32, %c0_33] : memref<1x2x128xf32, #tpu.memory_space<vmem>>, vector<1x1x128xf32>
    %31 = vector.shape_cast %30 : vector<1x1x128xf32> to vector<1x128xf32>
    %32 = vector.shape_cast %29 : vector<1x128xf32> to vector<1x1x128xf32>
    tpu.vector_store %arg4[%c0_31, %c1_32, %c0_33], %32 {strides = array<i32>} : memref<1x2x128xf32, #tpu.memory_space<vmem>>, vector<1x1x128xf32>,
    %33 = vector.shape_cast %21 : vector<16x128xf32> to vector<1x16x128xf32>
    %c0_34 = arith.constant 0 : index
    %c0_35 = arith.constant 0 : index
    %c0_36 = arith.constant 0 : index
    %34 = vector.load %arg3[%c0_34, %c0_35, %c0_36] : memref<1x16x128xf32, #tpu.memory_space<vmem>>, vector<1x16x128xf32>
    tpu.vector_store %arg3[%c0_34, %c0_35, %c0_36], %33 {strides = array<i32>} : memref<1x16x128xf32, #tpu.memory_space<vmem>>, vector<1x16x128xf32>,
    return
  }
  func.func @transform_0(%arg0: i32) -> (i32, i32, i32) {
    %c0_i32 = arith.constant 0 : i32
    %c0_i32_0 = arith.constant 0 : i32
    %c0_i32_1 = arith.constant 0 : i32
    return %arg0, %c0_i32, %c0_i32_0 : i32, i32, i32
  }
  func.func @transform_1(%arg0: i32) -> (i32, i32, i32) {
    %c0_i32 = arith.constant 0 : i32
    %c0_i32_0 = arith.constant 0 : i32
    %c0_i32_1 = arith.constant 0 : i32
    %c0_i32_2 = arith.constant 0 : i32
    return %c0_i32, %c0_i32_0, %c0_i32_1 : i32, i32, i32
  }
  func.func @transform_2(%arg0: i32) -> (i32, i32, i32) {
    %c0_i32 = arith.constant 0 : i32
    %c0_i32_0 = arith.constant 0 : i32
    %c0_i32_1 = arith.constant 0 : i32
    return %arg0, %c0_i32, %c0_i32_0 : i32, i32, i32
  }
  func.func @transform_3(%arg0: i32) -> (i32, i32, i32) {
    %c0_i32 = arith.constant 0 : i32
    %c0_i32_0 = arith.constant 0 : i32
    %c0_i32_1 = arith.constant 0 : i32
    return %arg0, %c0_i32, %c0_i32_0 : i32, i32, i32
  }
}

module attributes {stable_mosaic.version = 11 : i64} {
  func.func @kernel(%arg0: i32, %arg1: memref<1x16x128xf32, #tpu.memory_space<vmem>>, %arg2: memref<1x1x128xf32, #tpu.memory_space<vmem>>, %arg3: memref<1x1x128xf32, #tpu.memory_space<vmem>>, %arg4: memref<3x144x128xbf16, #tpu.memory_space<vmem>>, %arg5: memref<1x16x128xf32, #tpu.memory_space<vmem>>, %arg6: memref<1x2x128xf32, #tpu.memory_space<vmem>>, %arg7: memref<1x18x144xbf16, #tpu.memory_space<vmem>>) attributes {dimension_semantics = [#tpu.dimension_semantics<parallel>], iteration_bounds = array<i64: 2>, scalar_prefetch = 0 : i64, scratch_operands = 1 : i64, tpu.core_type = #tpu.core_type<tc>, window_params = [{transform_indices = @transform_0, window_bounds = array<i64: 1, 16, 128>}, {pipeline_mode = #tpu.pipeline_mode<synchronous>, transform_indices = @transform_1, window_bounds = array<i64: 1, 1, 128>}, {pipeline_mode = #tpu.pipeline_mode<synchronous>, transform_indices = @transform_2, window_bounds = array<i64: 1, 1, 128>}, {pipeline_mode = #tpu.pipeline_mode<synchronous>, transform_indices = @transform_3, window_bounds = array<i64: 3, 144, 128>}, {transform_indices = @transform_4, window_bounds = array<i64: 1, 16, 128>}, {transform_indices = @transform_5, window_bounds = array<i64: 1, 2, 128>}]} {
    %c0 = arith.constant 0 : index
    %c0_0 = arith.constant 0 : index
    %c0_1 = arith.constant 0 : index
    %0 = vector.load %arg1[%c0, %c0_0, %c0_1] : memref<1x16x128xf32, #tpu.memory_space<vmem>>, vector<1x16x128xf32>
    %c0_2 = arith.constant 0 : index
    %c0_3 = arith.constant 0 : index
    %c0_4 = arith.constant 0 : index
    %1 = vector.load %arg2[%c0_2, %c0_3, %c0_4] : memref<1x1x128xf32, #tpu.memory_space<vmem>>, vector<1x1x128xf32>
    %2 = vector.broadcast %1 : vector<1x1x128xf32> to vector<1x16x128xf32>
    %3 = arith.mulf %0, %2 : vector<1x16x128xf32>
    %c0_5 = arith.constant 0 : index
    %c0_6 = arith.constant 0 : index
    %c0_7 = arith.constant 0 : index
    %4 = vector.load %arg3[%c0_5, %c0_6, %c0_7] : memref<1x1x128xf32, #tpu.memory_space<vmem>>, vector<1x1x128xf32>
    %5 = vector.broadcast %4 : vector<1x1x128xf32> to vector<1x16x128xf32>
    %6 = arith.addf %3, %5 : vector<1x16x128xf32>
    %cst = arith.constant 0.000000e+00 : f32
    %7 = vector.broadcast %cst : f32 to vector<1x16x128xf32>
    %8 = arith.maximumf %6, %7 : vector<1x16x128xf32>
    %cst_8 = arith.constant 0.000000e+00 : bf16
    %9 = vector.broadcast %cst_8 : bf16 to vector<1x18x144xbf16>
    %c0_9 = arith.constant 0 : index
    %c0_10 = arith.constant 0 : index
    %c0_11 = arith.constant 0 : index
    %10 = vector.load %arg7[%c0_9, %c0_10, %c0_11] : memref<1x18x144xbf16, #tpu.memory_space<vmem>>, vector<1x18x144xbf16>
    tpu.vector_store %arg7[%c0_9, %c0_10, %c0_11], %9 {strides = array<i32>} : memref<1x18x144xbf16, #tpu.memory_space<vmem>>, vector<1x18x144xbf16>,
    %11 = arith.truncf %8 : vector<1x16x128xf32> to vector<1x16x128xbf16>
    %c0_12 = arith.constant 0 : index
    %c1 = arith.constant 1 : index
    %c8 = arith.constant 8 : index
    %12 = vector.load %arg7[%c0_12, %c1, %c8] : memref<1x18x144xbf16, #tpu.memory_space<vmem>>, vector<1x16x128xbf16>
    tpu.vector_store %arg7[%c0_12, %c1, %c8], %11 {strides = array<i32>} : memref<1x18x144xbf16, #tpu.memory_space<vmem>>, vector<1x16x128xbf16>,
    %c0_13 = arith.constant 0 : index
    %c0_14 = arith.constant 0 : index
    %c0_15 = arith.constant 0 : index
    %13 = vector.load %arg7[%c0_13, %c0_14, %c0_15] : memref<1x18x144xbf16, #tpu.memory_space<vmem>>, vector<1x16x144xbf16>
    %14 = vector.shape_cast %13 : vector<1x16x144xbf16> to vector<16x144xbf16>
    %c0_16 = arith.constant 0 : index
    %c0_17 = arith.constant 0 : index
    %c0_18 = arith.constant 0 : index
    %15 = vector.load %arg4[%c0_16, %c0_17, %c0_18] : memref<3x144x128xbf16, #tpu.memory_space<vmem>>, vector<1x144x128xbf16>
    %16 = vector.shape_cast %15 : vector<1x144x128xbf16> to vector<144x128xbf16>
    %cst_19 = arith.constant dense<0.000000e+00> : vector<16x128xf32>
    %17 = tpu.matmul %14, %16, %cst_19 {dimension_numbers = #tpu.dot_dimension_numbers<[1], [0], [0], [1], [0, 0, 1, 1], [], []>} : vector<16x144xbf16>, vector<144x128xbf16>, vector<16x128xf32> -> vector<16x128xf32>
    %c0_20 = arith.constant 0 : index
    %c1_21 = arith.constant 1 : index
    %c0_22 = arith.constant 0 : index
    %18 = vector.load %arg7[%c0_20, %c1_21, %c0_22] : memref<1x18x144xbf16, #tpu.memory_space<vmem>>, vector<1x16x144xbf16>
    %19 = vector.shape_cast %18 : vector<1x16x144xbf16> to vector<16x144xbf16>
    %c1_23 = arith.constant 1 : index
    %c0_24 = arith.constant 0 : index
    %c0_25 = arith.constant 0 : index
    %20 = vector.load %arg4[%c1_23, %c0_24, %c0_25] : memref<3x144x128xbf16, #tpu.memory_space<vmem>>, vector<1x144x128xbf16>
    %21 = vector.shape_cast %20 : vector<1x144x128xbf16> to vector<144x128xbf16>
    %cst_26 = arith.constant dense<0.000000e+00> : vector<16x128xf32>
    %22 = tpu.matmul %19, %21, %cst_26 {dimension_numbers = #tpu.dot_dimension_numbers<[1], [0], [0], [1], [0, 0, 1, 1], [], []>} : vector<16x144xbf16>, vector<144x128xbf16>, vector<16x128xf32> -> vector<16x128xf32>
    %23 = arith.addf %17, %22 : vector<16x128xf32>
    %c0_27 = arith.constant 0 : index
    %c2 = arith.constant 2 : index
    %c0_28 = arith.constant 0 : index
    %24 = vector.load %arg7[%c0_27, %c2, %c0_28] : memref<1x18x144xbf16, #tpu.memory_space<vmem>>, vector<1x16x144xbf16>
    %25 = vector.shape_cast %24 : vector<1x16x144xbf16> to vector<16x144xbf16>
    %c2_29 = arith.constant 2 : index
    %c0_30 = arith.constant 0 : index
    %c0_31 = arith.constant 0 : index
    %26 = vector.load %arg4[%c2_29, %c0_30, %c0_31] : memref<3x144x128xbf16, #tpu.memory_space<vmem>>, vector<1x144x128xbf16>
    %27 = vector.shape_cast %26 : vector<1x144x128xbf16> to vector<144x128xbf16>
    %cst_32 = arith.constant dense<0.000000e+00> : vector<16x128xf32>
    %28 = tpu.matmul %25, %27, %cst_32 {dimension_numbers = #tpu.dot_dimension_numbers<[1], [0], [0], [1], [0, 0, 1, 1], [], []>} : vector<16x144xbf16>, vector<144x128xbf16>, vector<16x128xf32> -> vector<16x128xf32>
    %29 = arith.addf %23, %28 : vector<16x128xf32>
    %cst_33 = arith.constant dense<0.000000e+00> : vector<128xf32>
    %30 = vector.multi_reduction <add>, %29, %cst_33 [0] : vector<16x128xf32> to vector<128xf32>
    %31 = vector.shape_cast %30 : vector<128xf32> to vector<1x128xf32>
    %c0_34 = arith.constant 0 : index
    %c0_35 = arith.constant 0 : index
    %c0_36 = arith.constant 0 : index
    %32 = vector.load %arg6[%c0_34, %c0_35, %c0_36] : memref<1x2x128xf32, #tpu.memory_space<vmem>>, vector<1x1x128xf32>
    %33 = vector.shape_cast %32 : vector<1x1x128xf32> to vector<1x128xf32>
    %34 = vector.shape_cast %31 : vector<1x128xf32> to vector<1x1x128xf32>
    tpu.vector_store %arg6[%c0_34, %c0_35, %c0_36], %34 {strides = array<i32>} : memref<1x2x128xf32, #tpu.memory_space<vmem>>, vector<1x1x128xf32>,
    %35 = arith.mulf %29, %29 : vector<16x128xf32>
    %cst_37 = arith.constant dense<0.000000e+00> : vector<128xf32>
    %36 = vector.multi_reduction <add>, %35, %cst_37 [0] : vector<16x128xf32> to vector<128xf32>
    %37 = vector.shape_cast %36 : vector<128xf32> to vector<1x128xf32>
    %c0_38 = arith.constant 0 : index
    %c1_39 = arith.constant 1 : index
    %c0_40 = arith.constant 0 : index
    %38 = vector.load %arg6[%c0_38, %c1_39, %c0_40] : memref<1x2x128xf32, #tpu.memory_space<vmem>>, vector<1x1x128xf32>
    %39 = vector.shape_cast %38 : vector<1x1x128xf32> to vector<1x128xf32>
    %40 = vector.shape_cast %37 : vector<1x128xf32> to vector<1x1x128xf32>
    tpu.vector_store %arg6[%c0_38, %c1_39, %c0_40], %40 {strides = array<i32>} : memref<1x2x128xf32, #tpu.memory_space<vmem>>, vector<1x1x128xf32>,
    %41 = vector.shape_cast %29 : vector<16x128xf32> to vector<1x16x128xf32>
    %c0_41 = arith.constant 0 : index
    %c0_42 = arith.constant 0 : index
    %c0_43 = arith.constant 0 : index
    %42 = vector.load %arg5[%c0_41, %c0_42, %c0_43] : memref<1x16x128xf32, #tpu.memory_space<vmem>>, vector<1x16x128xf32>
    tpu.vector_store %arg5[%c0_41, %c0_42, %c0_43], %41 {strides = array<i32>} : memref<1x16x128xf32, #tpu.memory_space<vmem>>, vector<1x16x128xf32>,
    return
  }
  func.func @transform_0(%arg0: i32) -> (i32, i32, i32) {
    %c0_i32 = arith.constant 0 : i32
    %c0_i32_0 = arith.constant 0 : i32
    %c0_i32_1 = arith.constant 0 : i32
    return %arg0, %c0_i32, %c0_i32_0 : i32, i32, i32
  }
  func.func @transform_1(%arg0: i32) -> (i32, i32, i32) {
    %c0_i32 = arith.constant 0 : i32
    %c0_i32_0 = arith.constant 0 : i32
    %c0_i32_1 = arith.constant 0 : i32
    %c0_i32_2 = arith.constant 0 : i32
    return %c0_i32, %c0_i32_0, %c0_i32_1 : i32, i32, i32
  }
  func.func @transform_2(%arg0: i32) -> (i32, i32, i32) {
    %c0_i32 = arith.constant 0 : i32
    %c0_i32_0 = arith.constant 0 : i32
    %c0_i32_1 = arith.constant 0 : i32
    %c0_i32_2 = arith.constant 0 : i32
    return %c0_i32, %c0_i32_0, %c0_i32_1 : i32, i32, i32
  }
  func.func @transform_3(%arg0: i32) -> (i32, i32, i32) {
    %c0_i32 = arith.constant 0 : i32
    %c0_i32_0 = arith.constant 0 : i32
    %c0_i32_1 = arith.constant 0 : i32
    %c0_i32_2 = arith.constant 0 : i32
    return %c0_i32, %c0_i32_0, %c0_i32_1 : i32, i32, i32
  }
  func.func @transform_4(%arg0: i32) -> (i32, i32, i32) {
    %c0_i32 = arith.constant 0 : i32
    %c0_i32_0 = arith.constant 0 : i32
    %c0_i32_1 = arith.constant 0 : i32
    return %arg0, %c0_i32, %c0_i32_0 : i32, i32, i32
  }
  func.func @transform_5(%arg0: i32) -> (i32, i32, i32) {
    %c0_i32 = arith.constant 0 : i32
    %c0_i32_0 = arith.constant 0 : i32
    %c0_i32_1 = arith.constant 0 : i32
    return %arg0, %c0_i32, %c0_i32_0 : i32, i32, i32
  }
}

</mosaic_0001>

<bundles_post_ra>
// kernel: basic_block_forward.2
= control target key start
LH: loop header
LB: loop body
LE: loop exit
PB: predicated region body
PF: predicated region fallthrough
CT: control target
= control target key end

     0   :  { %s815_s12 = smov 0   ;;  %s918_s0 = inlined_call_operand.vmem [shape: f32[2,16,64], index: 0, kind: input, shape index: {}]   ;;  %s919_s1 = inlined_call_operand.vmem [shape: bf16[3,72,128], index: 1, kind: input, shape index: {}]   ;;  %s920_s2 = inlined_call_operand.vmem [shape: f32[2,16,128], index: 2, kind: output, shape index: {0}]   ;;  %s921_s3 = inlined_call_operand.vmem [shape: f32[2,2,128], index: 3, kind: output, shape index: {1}]  }
   0x1 LB: > { %s630_s13 = sadd.s32 4294967295, %s789_s12   ;;  %p634_p0 = scmp.ge.s32.totalorder %s789_s12, 1  ;;  %s789_s12 = sphi %s815_s12, %s14_s12  }
   0x2   : > { %p140_p1 = scmp.lt.s32.totalorder %s789_s12, 3 }
   0x4   : > { %p141_p2 = pnand %p634_p0, %p140_p1 }
   0x5   : > { %p168_p3 = scmp.lt.s32.totalorder (!%p141_p2), %s630_s13, 1  ;;  %vm185_vm0 = vcmask (!%p141_p2), 584704   ;;  %v791_v0 = vmov (!%p141_p2), 0.0   ;;  %v765_v1 = vld [vmem:[%s919_s1] sm:$0xff] (!%p141_p2)   ;;  %v766_v3 = vld [vmem:[%s919_s1 + $0x8] sm:$0xff] (!%p141_p2)   ;;  %v792_v4 = vmov (!%p141_p2), 0  }
   0x6   : > { %144 = sbr.rel (%p141_p2) target bundleno = 407 (0x197), region = 28  ;;  %719 = vmatprep.subr.bf16.mxu0 (!%p141_p2), %v791_v0  ;;  %705 = vmatprep.subr.bf16.mxu1 (!%p141_p2), %v791_v0  ;;  %v767_v2 = vld [vmem:[%s919_s1 + $0x24] sm:$0xff] (!%p141_p2)   ;;  %186 = vst.msk [vmem:[#allocation2] sm:$0xf] (!%p141_p2), %vm185_vm0, %v792_v4  ;;  %187 = vst.msk [vmem:[#allocation2 + $0x4] sm:$0xf] (!%p141_p2), %vm185_vm0, %v792_v4 }
   0x7   : > { %720 = vmatpush3.bf16.msra.mxu0 (!%p141_p2), %v765_v1  ;;  %706 = vmatpush3.bf16.msra.mxu1 (!%p141_p2), %v767_v2  ;;  %vm188_vm1 = vcmask (!%p141_p2), 581632   ;;  %vm196_vm2 = vsmask.f32 (!%p141_p2), 256  ;;  %vm197_vm3 = vsmask.f32 (!%p141_p2), 4368  ;;  %v769_v9 = vld [vmem:[%s919_s1 + $0x2c] sm:$0xff] (!%p141_p2)  }
   0x8   : > { %721 = vmatprep.subr.bf16.mxu0 (!%p141_p2), %v791_v0  ;;  %189 = vst.msk [vmem:[#allocation2 + $0x8] sm:$0x1] (!%p141_p2), %vm188_vm1, %v792_v4  ;;  %707 = vmatprep.subr.bf16.mxu1 (!%p141_p2), %v791_v0  ;;  %v768_v10 = vld [vmem:[%s919_s1 + $0x10] sm:$0xff] (!%p141_p2)   ;;  %vm793_vm4 = vmmov (!%p141_p2), 0   ;;  %v772_v18 = vld [vmem:[%s919_s1 + $0x20] ss:$0 sps:$4 sm:$0xff] (!%p141_p2)   ;;  %vm198_vm6 = vmor (!%p141_p2), %vm196_vm2, %vm197_vm3 }
   0x9   : > { %729 = vmatprep.mubr.msk.bf16.mxu0 (!%p141_p2), %vm793_vm4, %v791_v0  ;;  %v771_v15 = vld [vmem:[%s919_s1 + $0x34] sm:$0xff] (!%p141_p2)   ;;  %715 = vmatprep.mubr.msk.bf16.mxu1 (!%p141_p2), %vm793_vm4, %v791_v0  ;;  %vm312_vm5 = vcmask (!%p141_p2), 1043456   ;;  %v773_v24 = vld [vmem:[%s919_s1 + $0x3c] sm:$0xff] (!%p141_p2)   ;;  %s794_s9 = smov (!%p141_p2), 4   ;;  %v777_v27 = vld [vmem:[%s919_s1 + $0x44] ss:$0 sps:$4 sm:$0xff] (!%p141_p2)  }
   0xa   : > { %v770_v19 = vld [vmem:[%s919_s1 + $0x18] sm:$0xff] (!%p141_p2)   ;;  %v387_v25 = vsel (!%p141_p2), %vm312_vm5, %v772_v18, 0  ;;  %v314_v28 = vsel (!%p141_p2), %vm312_vm5, %v777_v27, 0  ;;  %vm225_vm7 = vcmask (!%p141_p2), 551968   ;;  %vm226_vm8 = vsmask.f32 (!%p141_p2), 7938 }
   0xb   : > { %722 = vmatpush3.bf16.msra.mxu0 (!%p141_p2), %v766_v3  ;;  %708 = vmatpush3.bf16.msra.mxu1 (!%p141_p2), %v769_v9  ;;  %vm233_vm9 = vcmask (!%p141_p2), 548896   ;;  %vm227_vm10 = vmand (!%p141_p2), %vm225_vm7, %vm226_vm8  ;;  %vm308_vm12 = vcmask (!%p141_p2), 588800   ;;  %v776_v39 = vld [vmem:[%s919_s1 + $0x48] sm:$0xff] (!%p141_p2)   ;;  %v778_v43 = vld [vmem:[%s919_s1 + $0x50] sm:$0xff] (!%p141_p2)   ;;  %vm268_vm13 = vsmask.f32 (!%p141_p2), 7424 }
   0xc   : > { %723 = vmatprep.subr.bf16.mxu0 (!%p141_p2), %v791_v0  ;;  %709 = vmatprep.subr.bf16.mxu1 (!%p141_p2), %v791_v0  ;;  %vm234_vm11 = vmand (!%p141_p2), %vm233_vm9, %vm196_vm2  ;;  %v780_v48 = vld [vmem:[%s919_s1 + $0x58] sm:$0xff] (!%p141_p2)   ;;  %v781_v50 = vld [vmem:[%s919_s1 + $0x60] sm:$0xff] (!%p141_p2)   ;;  %vm444_vm14 = vcmask (!%p141_p2), 1046528  }
   0xd   : > { %s923_s13 = smov (!%p168_p3, %s630_s13), 1  ;;  %v228_v29 = vld [vmem:[#allocation2] sm:$0xf]  ;;  %v782_v52 = vld [vmem:[%s919_s1 + $0x68] ss:$0 sps:$4 sm:$0xff]  }
   0xe   : > { %s683_s18 = sshll.u32 %s923_s13, 4  ;;  %v479_v54 = vsel %vm312_vm5, %v782_v52, 0  ;;  %s639_s28 = sshll.u32 %s923_s13, 1 }
   0xf   : > { %s172_s23 = scalar_lea.vmem %s918_s0, %s683_s18  ;;  %724 = vmatpush3.bf16.msra.mxu0 %v768_v10  ;;  %710 = vmatpush3.bf16.msra.mxu1 %v771_v15  ;;  %v235_v30 = vld [vmem:[#allocation2 + $0x8] sm:$0x1]  ;;  %s177_s27 = scalar_lea.vmem %s920_s2, %s683_s18 }
  0x10   : > { %v183_v5 = vld [vmem:[%s172_s23] sm:$0xff]  ;;  %v184_v6 = vld [vmem:[%s172_s23 + $0x8] sm:$0xff]  ;;  %725 = vmatprep.subr.bf16.mxu0 %v791_v0  ;;  %711 = vmatprep.subr.bf16.mxu1 %v791_v0  ;;  %s181_s30 = scalar_lea.vmem %s921_s3, %s639_s28 }
  0x11   : > { %v685_v7 = vpack.c.bf16 %v183_v5, %v183_v5  ;;  %v686_v8 = vpack.c.bf16 %v184_v6, %v184_v6 }
  0x13   : > { %v200_v11 = vshrl.u32 %v685_v7, 16  ;;  %v203_v12 = vshll.u32 %v685_v7, 16  ;;  %v208_v13 = vshrl.u32 %v686_v8, 16  ;;  %v211_v14 = vshll.u32 %v686_v8, 16  ;;  %726 = vmatpush3.bf16.msra.mxu0 %v770_v19  ;;  %712 = vmatpush3.bf16.msra.mxu1 %v773_v24 }
  0x14   : > { %727 = vmatprep.subr.bf16.mxu0 %v791_v0  ;;  %713 = vmatprep.subr.bf16.mxu1 %v791_v0 }
  0x15   : > { %v202_v16 = vrot.slane %v200_v11, 7  ;;  %v210_v17 = vrot.slane %v208_v13, 7 }
  0x17   : > { %v205_v20 = vor.u32 %v203_v12, %v202_v16  ;;  %v206_v21 = vrot.slane %v202_v16, 4  ;;  %v215_v22 = vrot.slane %v210_v17, 4  ;;  %v213_v23 = vor.u32 %v211_v14, %v210_v17  ;;  %728 = vmatpush3.bf16.msra.mxu0 %v387_v25  ;;  %714 = vmatpush3.bf16.msra.mxu1 %v314_v28 }
  0x18   : > { %733 = vmatprep.subr.bf16.mxu0 %v791_v0 }
  0x19   : > { %216 = vrot.lane.b32.xlu0 %v205_v20, %s794_s9  ;;  %220 = vrot.lane.b32.xlu1 %v215_v22, %s794_s9  ;;  %v214_v26 = vsel %vm198_vm6, %v206_v21, %v213_v23 }
  0x1d   : > { %218 = vrot.lane.b32.xlu0 %v214_v26, %s794_s9 }
  0x8b   : > { %v217_v31 = vpop.permute.xlu0 %216  ;;  %v221_v32 = vpop.permute.xlu1 %220 }
  0x8c   : > { %v229_v33 = vsel %vm227_vm10, %v217_v31, %v228_v29  ;;  %v236_v34 = vsel %vm234_vm11, %v221_v32, %v235_v30 }
  0x8d   : > { %230 = vst [vmem:[#allocation2] sm:$0xf] %v229_v33  ;;  %237 = vst [vmem:[#allocation2 + $0x8] sm:$0x1] %v236_v34 }
  0x8f   : > { %v219_v35 = vpop.permute.xlu0 %218 }
  0x90   : > { %232 = vst.msk [vmem:[#allocation2 + $0x4] sm:$0xf] %vm225_vm7, %v219_v35 }
  0x94   : > { %v779_v36 = vld [vmem:[#allocation2 + $0x8] ss:$0 sps:$4 sm:$0x11]   ;;  %v238_v37 = vld [vmem:[#allocation2] sm:$0xf] }
  0x95   : > { %v277_v41 = vshll.u32 %v779_v36, 16  ;;  %v430_v51 = vld [vmem:[#allocation2] sm:$0xe]  ;;  %v446_v56 = vrot.slane %v779_v36, 1 }
  0x97   : > { %v239_v38 = vld [vmem:[#allocation2 + $0x4] sm:$0xf]  ;;  %v279_v46 = vrot.slane %v277_v41, 1 }
  0x98   : > { %v651_v40 = vcombine.low %v238_v37, %v239_v38  ;;  %v674_v53 = vcombine.low %v430_v51, %v239_v38 }
  0x9a   : > { %730 = vmatmul.mubr.msk.bf16.vlgmr.msra.gmra.mrb[0].mxu0 %vm308_vm12, %v651_v40  ;;  %v272_v42 = vshll.u32 %v651_v40, 16  ;;  %v270_v44 = vshrl.u32 %v651_v40, 16  ;;  %v445_v55 = vrot.slane %v674_v53, 1 }
  0x9b   : > { %734 = vmatpush3.bf16.msra.mxu0 %v776_v39  ;;  %743 = vmatprep.mubr.msk.bf16.mxu0 %vm793_vm4, %v791_v0 }
  0x9c   : > { %735 = vmatprep.subr.bf16.mxu0 %v791_v0  ;;  %v274_v45 = vrot.slane %v272_v42, 1  ;;  %v447_v57 = vsel %vm444_vm14, %v445_v55, %v446_v56 }
  0x9e   : > { %v275_v47 = vor.u32 %v274_v45, %v270_v44 }
  0x9f   : > { %736 = vmatpush3.bf16.msra.mxu0 %v778_v43 }
  0xa0   : > { %v280_v49 = vsel %vm268_vm13, %v275_v47, %v279_v46  ;;  %737 = vmatprep.subr.bf16.mxu0 %v791_v0 }
  0xa1   : > { %716 = vmatmul.mubr.msk.bf16.vlgmr.msra.gmra.mrb[0].mxu1 %vm308_vm12, %v280_v49 }
  0xa3   : > { %738 = vmatpush3.bf16.msra.mxu0 %v780_v48 }
  0xa4   : > { %739 = vmatprep.subr.bf16.mxu0 %v791_v0 }
  0xa7   : > { %740 = vmatpush3.bf16.msra.mxu0 %v781_v50 }
  0xa8   : > { %741 = vmatprep.subr.bf16.mxu0 %v791_v0 }
  0xab   : > { %742 = vmatpush3.bf16.msra.mxu0 %v479_v54 }
  0xae   : > { %744 = vmatmul.mubr.msk.bf16.vlgmr.msra.gmra.mrb[0].mxu0 %vm308_vm12, %v447_v57 }
 0x174   : > { %v350_v58 = vpop.f32.mrb[0].mxu1 }
 0x175   : > { %v717_v59 = vpop.f32.mrb[1].mxu1 }
 0x176   : > { %v353_v60 = vpop.f32.mrb[2].mxu1 }
 0x177   : > { %v718_v61 = vpop.f32.mrb[3].mxu1 }
 0x181   : > { %v515_v62 = vpop.f32.mrb[0].mxu0 }
 0x182   : > { %v747_v63 = vadd.f32 %v515_v62, %v350_v58  ;;  %v745_v0 = vpop.f32.mrb[1].mxu0 }
 0x183   : > { %v518_v1 = vpop.f32.mrb[2].mxu0 }
 0x184   : > { %542 = vst [vmem:[%s177_s27] sm:$0xff] %v747_v63  ;;  %v748_v2 = vadd.f32 %v518_v1, %v353_v60  ;;  %v746_v3 = vpop.f32.mrb[3].mxu0  ;;  %v532_v4 = vmul.f32 %v747_v63, %v747_v63 }
 0x186   : > { %v524_v5 = vadd.f32 %v748_v2, %v747_v63  ;;  %v533_v6 = vmul.f32 %v748_v2, %v748_v2  ;;  %543 = vst [vmem:[%s177_s27 + $0x8] sm:$0xff] %v748_v2 }
 0x188   : > { %v525_v7 = vrot.slane %v524_v5, 4  ;;  %v534_v8 = vadd.f32 %v533_v6, %v532_v4 }
 0x18a   : > { %v526_v9 = vadd.f32 %v525_v7, %v524_v5  ;;  %v535_v10 = vrot.slane %v534_v8, 4 }
 0x18c   : > { %v527_v11 = vrot.slane %v526_v9, 2  ;;  %v536_v12 = vadd.f32 %v535_v10, %v534_v8 }
 0x18e   : > { %v528_v13 = vadd.f32 %v527_v11, %v526_v9  ;;  %v537_v14 = vrot.slane %v536_v12, 2 }
 0x190   : > { %v529_v15 = vrot.slane %v528_v13, 1  ;;  %v538_v16 = vadd.f32 %v537_v14, %v536_v12 }
 0x192   : > { %v530_v17 = vadd.f32 %v529_v15, %v528_v13  ;;  %v539_v18 = vrot.slane %v538_v16, 1 }
 0x194   : > { %531 = vst [vmem:[%s181_s30] sm:$0x1] %v530_v17  ;;  %v540_v19 = vadd.f32 %v539_v18, %v538_v16 }
 0x196   : > { %541 = vst [vmem:[%s181_s30 + $0x1] sm:$0x1] %v540_v19 }
 0x197 PF: > { %s14_s12 = sadd.s32 1, %s789_s12  }
 0x198   : > { %p11_p4 = scmp.ge.s32.totalorder %s14_s12, 4  }
 0x19a   :  { %13 = sbr.rel (!%p11_p4) target bundleno = 1 (0x1), region = 72 }

// kernel: tile.27
= control target key start
LH: loop header
LB: loop body
LE: loop exit
PB: predicated region body
PF: predicated region fallthrough
CT: control target
= control target key end

     0   :  { %s28_s0 = inlined_call_operand.vmem [shape: f32[8], index: 0, kind: input, shape index: {}]   ;;  %s29_s1 = inlined_call_operand.vmem [shape: f32[16,8], index: 1, kind: output, shape index: {}]  }
   0x1   :  { %v4_v0 = vld [vmem:[%s28_s0] ss:$0 sm:$0xff] }
   0x2   :  { %5 = vst [vmem:[%s29_s1] sm:$0xff] %v4_v0  ;;  %8 = vst [vmem:[%s29_s1 + $0x8] sm:$0xff] %v4_v0 }

// kernel: tile.29
= control target key start
LH: loop header
LB: loop body
LE: loop exit
PB: predicated region body
PF: predicated region fallthrough
CT: control target
= control target key end

     0   :  { %s131_s10 = smov 120   ;;  %s132_s11 = smov 104   ;;  %vm3_vm0 = vcmask 64512   ;;  %vm9_vm1 = vcmask 1048512   ;;  %vm15_vm2 = vcmask 982912   ;;  %vm21_vm3 = vcmask 917312   ;;  %s207_s0 = inlined_call_operand.vmem [shape: f32[16,8], index: 0, kind: input, shape index: {}]   ;;  %s208_s1 = inlined_call_operand.vmem [shape: f32[1,1,128], index: 1, kind: output, shape index: {}]  }
   0x1   :  { %v101_v0 = vld [vmem:[%s207_s0 + $0xf] sm:$0x1]   ;;  %v103_v1 = vld [vmem:[%s207_s0 + $0xd] sm:$0x1]   ;;  %v102_v2 = vld [vmem:[%s207_s0 + $0xe] sm:$0x1]  }
   0x2   :  { %7 = vrot.lane.b32.xlu0 %v101_v0, %s131_s10  ;;  %19 = vrot.lane.b32.xlu1 %v103_v1, %s132_s11  ;;  %v104_v3 = vld [vmem:[%s207_s0 + $0xc] sm:$0x1]   ;;  %s133_s16 = smov 112   ;;  %s134_s17 = smov 96   ;;  %v105_v4 = vld [vmem:[%s207_s0 + $0xb] sm:$0x1]  }
   0x3   :  { %v106_v5 = vld [vmem:[%s207_s0 + $0xa] sm:$0x1]   ;;  %v2_v6 = vld [vmem:[%s207_s0] sm:$0x1]   ;;  %s135_s24 = smov 88   ;;  %s136_s25 = smov 80  }
   0x4   :  { %4 = vst.msk [vmem:[#allocation0] sm:$0x1] %vm3_vm0, %v2_v6   ;;  %v107_v7 = vld [vmem:[%s207_s0 + $0x9] sm:$0x1]   ;;  %v108_v8 = vld [vmem:[%s207_s0 + $0x8] sm:$0x1]  }
   0x5   :  { %s137_s30 = smov 72   ;;  %s138_s2 = smov 64   ;;  %v109_v9 = vld [vmem:[%s207_s0 + $0x7] sm:$0x1]   ;;  %v110_v10 = vld [vmem:[%s207_s0 + $0x6] sm:$0x1]  }
   0x6   :  { %13 = vrot.lane.b32.xlu0 %v102_v2, %s133_s16  ;;  %25 = vrot.lane.b32.xlu1 %v104_v3, %s134_s17  ;;  %s139_s7 = smov 56   ;;  %s140_s8 = smov 48   ;;  %v111_v11 = vld [vmem:[%s207_s0 + $0x5] sm:$0x1]   ;;  %v112_v12 = vld [vmem:[%s207_s0 + $0x4] sm:$0x1]  }
   0x7   :  { %s141_s13 = smov 40   ;;  %s142_s14 = smov 32   ;;  %v113_v13 = vld [vmem:[%s207_s0 + $0x3] sm:$0x1]   ;;  %v114_v14 = vld [vmem:[%s207_s0 + $0x2] sm:$0x1]  }
   0x8   :  { %s143_s19 = smov 24   ;;  %s144_s20 = smov 16   ;;  %v115_v15 = vld [vmem:[%s207_s0 + $0x1] sm:$0x1]   ;;  %vm27_vm4 = vcmask 851712   ;;  %vm33_vm5 = vcmask 786112  }
   0x9   :  { %s145_s0 = smov 8   ;;  %vm39_vm6 = vcmask 720512   ;;  %vm45_vm7 = vcmask 654912   ;;  %vm51_vm8 = vcmask 589312   ;;  %vm57_vm9 = vcmask 523712  }
   0xa   :  { %31 = vrot.lane.b32.xlu0 %v105_v4, %s135_s24  ;;  %37 = vrot.lane.b32.xlu1 %v106_v5, %s136_s25  ;;  %vm63_vm10 = vcmask 458112   ;;  %vm69_vm11 = vcmask 392512   ;;  %vm75_vm12 = vcmask 326912   ;;  %vm81_vm13 = vcmask 261312  }
   0xb   :  { %vm87_vm14 = vcmask 195712   ;;  %vm93_vm15 = vcmask 130112  }
   0xe   :  { %43 = vrot.lane.b32.xlu0 %v107_v7, %s137_s30  ;;  %49 = vrot.lane.b32.xlu1 %v108_v8, %s138_s2 }
  0x12   :  { %55 = vrot.lane.b32.xlu0 %v109_v9, %s139_s7  ;;  %61 = vrot.lane.b32.xlu1 %v110_v10, %s140_s8 }
  0x16   :  { %67 = vrot.lane.b32.xlu0 %v111_v11, %s141_s13  ;;  %73 = vrot.lane.b32.xlu1 %v112_v12, %s142_s14 }
  0x1a   :  { %79 = vrot.lane.b32.xlu0 %v113_v13, %s143_s19  ;;  %85 = vrot.lane.b32.xlu1 %v114_v14, %s144_s20 }
  0x1e   :  { %91 = vrot.lane.b32.xlu0 %v115_v15, %s145_s0 }
  0x74   :  { %v8_v16 = vpop.permute.xlu0 %7   ;;  %v20_v17 = vpop.permute.xlu1 %19  }
  0x75   :  { %10 = vst.msk [vmem:[#allocation0] sm:$0x1] %vm9_vm1, %v8_v16  }
  0x78   :  { %v14_v18 = vpop.permute.xlu0 %13   ;;  %v26_v19 = vpop.permute.xlu1 %25  }
  0x79   :  { %16 = vst.msk [vmem:[#allocation0] sm:$0x1] %vm15_vm2, %v14_v18  }
  0x7a   :  { %22 = vst.msk [vmem:[#allocation0] sm:$0x1] %vm21_vm3, %v20_v17  }
  0x7b   :  { %28 = vst.msk [vmem:[#allocation0] sm:$0x1] %vm27_vm4, %v26_v19  }
  0x7c   :  { %v32_v20 = vpop.permute.xlu0 %31   ;;  %v38_v21 = vpop.permute.xlu1 %37  }
  0x7d   :  { %34 = vst.msk [vmem:[#allocation0] sm:$0x1] %vm33_vm5, %v32_v20  }
  0x7e   :  { %40 = vst.msk [vmem:[#allocation0] sm:$0x1] %vm39_vm6, %v38_v21  }
  0x80   :  { %v44_v22 = vpop.permute.xlu0 %43   ;;  %v50_v23 = vpop.permute.xlu1 %49  }
  0x81   :  { %46 = vst.msk [vmem:[#allocation0] sm:$0x1] %vm45_vm7, %v44_v22  }
  0x82   :  { %52 = vst.msk [vmem:[#allocation0] sm:$0x1] %vm51_vm8, %v50_v23  }
  0x84   :  { %v56_v24 = vpop.permute.xlu0 %55   ;;  %v62_v25 = vpop.permute.xlu1 %61  }
  0x85   :  { %58 = vst.msk [vmem:[#allocation0] sm:$0x1] %vm57_vm9, %v56_v24  }
  0x86   :  { %64 = vst.msk [vmem:[#allocation0] sm:$0x1] %vm63_vm10, %v62_v25  }
  0x88   :  { %v68_v26 = vpop.permute.xlu0 %67   ;;  %v74_v27 = vpop.permute.xlu1 %73  }
  0x89   :  { %70 = vst.msk [vmem:[#allocation0] sm:$0x1] %vm69_vm11, %v68_v26  }
  0x8a   :  { %76 = vst.msk [vmem:[#allocation0] sm:$0x1] %vm75_vm12, %v74_v27  }
  0x8c   :  { %v80_v28 = vpop.permute.xlu0 %79   ;;  %v86_v29 = vpop.permute.xlu1 %85  }
  0x8d   :  { %82 = vst.msk [vmem:[#allocation0] sm:$0x1] %vm81_vm13, %v80_v28  }
  0x8e   :  { %88 = vst.msk [vmem:[#allocation0] sm:$0x1] %vm87_vm14, %v86_v29  }
  0x90   :  { %v92_v30 = vpop.permute.xlu0 %91  }
  0x91   :  { %94 = vst.msk [vmem:[#allocation0] sm:$0x1] %vm93_vm15, %v92_v30  }
  0x98   :  { %v98_v31 = vld [vmem:[#allocation0] sm:$0x1] }
  0x99   :  { %100 = vst [vmem:[%s208_s1] sm:$0x1] %v98_v31 }

// kernel: basic_block_forward.3
= control target key start
LH: loop header
LB: loop body
LE: loop exit
PB: predicated region body
PF: predicated region fallthrough
CT: control target
= control target key end

     0   :  { %s1027_s18 = smov 0   ;;  %s1192_s0 = inlined_call_operand.vmem [shape: f32[2,16,128], index: 0, kind: input, shape index: {}]   ;;  %s1193_s1 = inlined_call_operand.vmem [shape: f32[1,1,128], index: 1, kind: input, shape index: {}]   ;;  %s1194_s2 = inlined_call_operand.vmem [shape: f32[1,1,128], index: 2, kind: input, shape index: {}]   ;;  %s1195_s3 = inlined_call_operand.vmem [shape: bf16[3,144,128], index: 3, kind: input, shape index: {}]   ;;  %s1196_s4 = inlined_call_operand.vmem [shape: f32[2,16,128], index: 4, kind: output, shape index: {0}]   ;;  %s1197_s5 = inlined_call_operand.vmem [shape: f32[2,2,128], index: 5, kind: output, shape index: {1}]  }
   0x1 LB: > { %s848_s19 = sadd.s32 4294967295, %s993_s18   ;;  %p852_p0 = scmp.ge.s32.totalorder %s993_s18, 1  ;;  %s993_s18 = sphi %s1027_s18, %s16_s18  }
   0x2   : > { %p190_p1 = scmp.lt.s32.totalorder %s993_s18, 3 }
   0x4   : > { %p191_p2 = pnand %p852_p0, %p190_p1 }
   0x5   : > { %p222_p3 = scmp.lt.s32.totalorder (!%p191_p2), %s848_s19, 1  ;;  %v995_v0 = vmov (!%p191_p2), 0   ;;  %v858_v1 = vld [vmem:[%s1193_s1] ss:$0 sm:$0xff] (!%p191_p2)  ;;  %v957_v4 = vld [vmem:[%s1195_s3 + $0x8] sm:$0xff] (!%p191_p2)   ;;  %vm259_vm0 = vcmask (!%p191_p2), 1043456  }
   0x6   : > { %194 = sbr.rel (%p191_p2) target bundleno = 433 (0x1b1), region = 36  ;;  %568 = vmatprep.subr.bf16.mxu0 (!%p191_p2), %v995_v0  ;;  %470 = vmatprep.subr.bf16.mxu1 (!%p191_p2), %v995_v0  ;;  %v956_v2 = vld [vmem:[%s1195_s3] sm:$0xff] (!%p191_p2)   ;;  %v958_v5 = vld [vmem:[%s1195_s3 + $0x48] sm:$0xff] (!%p191_p2)   ;;  %v960_v10 = vld [vmem:[%s1195_s3 + $0x50] sm:$0xff] (!%p191_p2)   ;;  %vm260_vm1 = vcmask (!%p191_p2), 130052   ;;  %vm264_vm3 = vcmask (!%p191_p2), 1040384  }
   0x7   : > { %v859_v3 = vld [vmem:[%s1194_s2] ss:$0 sm:$0xff] (!%p191_p2)  ;;  %569 = vmatpush1.bf16.msra.mxu0 (!%p191_p2), %v956_v2  ;;  %471 = vmatpush1.bf16.msra.mxu1 (!%p191_p2), %v958_v5  ;;  %v959_v13 = vld [vmem:[%s1195_s3 + $0x10] sm:$0xff] (!%p191_p2)   ;;  %v962_v16 = vld [vmem:[%s1195_s3 + $0x58] sm:$0xff] (!%p191_p2)   ;;  %vm265_vm4 = vcmask (!%p191_p2), 126980   ;;  %s996_s26 = smov (!%p191_p2), 8  }
   0x8   : > { %570 = vmatprep.subr.bf16.mxu0 (!%p191_p2), %v995_v0  ;;  %472 = vmatprep.subr.bf16.mxu1 (!%p191_p2), %v995_v0  ;;  %vm261_vm2 = vmor (!%p191_p2), %vm260_vm1, %vm259_vm0  ;;  %v961_v19 = vld [vmem:[%s1195_s3 + $0x18] sm:$0xff] (!%p191_p2)   ;;  %v964_v20 = vld [vmem:[%s1195_s3 + $0x60] sm:$0xff] (!%p191_p2)   ;;  %vm274_vm6 = vsmask.f32 (!%p191_p2), 256  ;;  %vm275_vm7 = vsmask.f32 (!%p191_p2), 4368 }
   0x9   : > { %262 = vst.msk [vmem:[#allocation2] sm:$0xff] (!%p191_p2), %vm261_vm2, %v995_v0  ;;  %263 = vst.msk [vmem:[#allocation2 + $0x8] sm:$0xff] (!%p191_p2), %vm261_vm2, %v995_v0  ;;  %v963_v27 = vld [vmem:[%s1195_s3 + $0x20] sm:$0xff] (!%p191_p2)   ;;  %v966_v32 = vld [vmem:[%s1195_s3 + $0x68] sm:$0xff] (!%p191_p2)   ;;  %vm324_vm9 = vcmask (!%p191_p2), 1040448   ;;  %vm310_vm10 = vcmask (!%p191_p2), 1043520  }
   0xa   : > { %vm266_vm5 = vmor (!%p191_p2), %vm265_vm4, %vm264_vm3  ;;  %v965_v34 = vld [vmem:[%s1195_s3 + $0x28] sm:$0xff] (!%p191_p2)   ;;  %v968_v35 = vld [vmem:[%s1195_s3 + $0x70] sm:$0xff] (!%p191_p2)   ;;  %vm311_vm11 = vsmask.f32 (!%p191_p2), 7938  ;;  %vm313_vm12 = vcmask (!%p191_p2), 64516   ;;  %vm326_vm15 = vcmask (!%p191_p2), 61444  }
   0xb   : > { %571 = vmatpush1.bf16.msra.mxu0 (!%p191_p2), %v957_v4  ;;  %473 = vmatpush1.bf16.msra.mxu1 (!%p191_p2), %v960_v10  ;;  %267 = vst.msk [vmem:[#allocation2 + $0x10] sm:$0x11] (!%p191_p2), %vm266_vm5, %v995_v0  ;;  %vm276_vm8 = vmor (!%p191_p2), %vm274_vm6, %vm275_vm7  ;;  %v967_v36 = vld [vmem:[%s1195_s3 + $0x30] sm:$0xff] (!%p191_p2)   ;;  %v970_v37 = vld [vmem:[%s1195_s3 + $0x78] sm:$0xff] (!%p191_p2)   ;;  %vm314_vm13 = vsmask.f32 (!%p191_p2), 7954 }
   0xc   : > { %572 = vmatprep.subr.bf16.mxu0 (!%p191_p2), %v995_v0  ;;  %474 = vmatprep.subr.bf16.mxu1 (!%p191_p2), %v995_v0  ;;  %v969_v38 = vld [vmem:[%s1195_s3 + $0x38] sm:$0xff] (!%p191_p2)   ;;  %v972_v39 = vld [vmem:[%s1195_s3 + $0x80] sm:$0xff] (!%p191_p2)   ;;  %v976_v41 = vld [vmem:[%s1195_s3 + $0x88] sm:$0xff] (!%p191_p2)   ;;  %vm327_vm0 = vsmask.f32 (!%p191_p2), 4352  ;;  %vm303_vm4 = vcmask (!%p191_p2), 64512  }
   0xd   : > { %s1201_s19 = smov (!%p222_p3, %s848_s19), 1  ;;  %v971_v40 = vld [vmem:[%s1195_s3 + $0x40] sm:$0xff]   ;;  %vm1127_vm14 = vmand %vm324_vm9, %vm274_vm6  ;;  %v973_v2 = vld [vmem:[%s1195_s3 + $0x90] sm:$0xff]   ;;  %vm634_vm9 = vcmask 1046528  }
   0xe   : > { %s936_s24 = sshll.u32 %s1201_s19, 4  ;;  %vm312_vm1 = vmand %vm310_vm10, %vm311_vm11  ;;  %s857_s17 = sshll.u32 %s1201_s19, 1 }
   0xf   : > { %s226_s6 = scalar_lea.vmem %s1192_s0, %s936_s24  ;;  %573 = vmatpush1.bf16.msra.mxu0 %v959_v13  ;;  %475 = vmatpush1.bf16.msra.mxu1 %v962_v16  ;;  %vm315_vm2 = vmand %vm313_vm12, %vm314_vm13  ;;  %s231_s16 = scalar_lea.vmem %s1196_s4, %s936_s24 }
  0x10   : > { %v237_v6 = vld [vmem:[%s226_s6] sm:$0xff]  ;;  %v238_v7 = vld [vmem:[%s226_s6 + $0x8] sm:$0xff]  ;;  %574 = vmatprep.subr.bf16.mxu0 %v995_v0  ;;  %476 = vmatprep.subr.bf16.mxu1 %v995_v0  ;;  %vm328_vm3 = vmand %vm326_vm15, %vm327_vm0  ;;  %s235_s21 = scalar_lea.vmem %s1197_s5, %s857_s17 }
  0x11   : > { %v246_v8 = vmul.f32 %v858_v1, %v237_v6  ;;  %v247_v9 = vmul.f32 %v858_v1, %v238_v7  ;;  %vm316_vm5 = vmor %vm315_vm2, %vm312_vm1  ;;  %v317_v45 = vld [vmem:[#allocation2] sm:$0xff] }
  0x12   : > { %vm329_vm7 = vmor %vm328_vm3, %vm1127_vm14  ;;  %v330_v47 = vld [vmem:[#allocation2 + $0x10] sm:$0x11] }
  0x13   : > { %v255_v11 = vadd.f32 %v859_v3, %v246_v8  ;;  %v256_v12 = vadd.f32 %v859_v3, %v247_v9  ;;  %575 = vmatpush1.bf16.msra.mxu0 %v961_v19  ;;  %477 = vmatpush1.bf16.msra.mxu1 %v964_v20  ;;  %vm322_vm6 = vmor %vm313_vm12, %vm310_vm10  ;;  %vm386_vm10 = vsmask.f32 7424  ;;  %v979_v20 = vld [vmem:[%s1195_s3 + $0xa0] sm:$0xff]  }
  0x14   : > { %576 = vmatprep.subr.bf16.mxu0 %v995_v0  ;;  %478 = vmatprep.subr.bf16.mxu1 %v995_v0 }
  0x15   : > { %v257_v14 = vmax.f32 %v255_v11, 0.0  ;;  %v258_v15 = vmax.f32 %v256_v12, 0.0  ;;  %v977_v12 = vld [vmem:[%s1195_s3 + $0x98] sm:$0xff]  }
  0x17   : > { %v938_v17 = vpack.c.bf16 %v257_v14, %v257_v14  ;;  %v939_v18 = vpack.c.bf16 %v258_v15, %v258_v15  ;;  %577 = vmatpush1.bf16.msra.mxu0 %v963_v27  ;;  %479 = vmatpush1.bf16.msra.mxu1 %v966_v32  ;;  %v985_v27 = vld [vmem:[%s1195_s3 + $0xd0] sm:$0xff]  }
  0x18   : > { %578 = vmatprep.subr.bf16.mxu0 %v995_v0  ;;  %480 = vmatprep.subr.bf16.mxu1 %v995_v0 }
  0x19   : > { %v278_v21 = vshrl.u32 %v938_v17, 16  ;;  %v281_v22 = vshll.u32 %v938_v17, 16  ;;  %v286_v23 = vshrl.u32 %v939_v18, 16  ;;  %v289_v24 = vshll.u32 %v939_v18, 16 }
  0x1b   : > { %v280_v25 = vrot.slane %v278_v21, 7  ;;  %v288_v26 = vrot.slane %v286_v23, 7  ;;  %579 = vmatpush1.bf16.msra.mxu0 %v965_v34  ;;  %481 = vmatpush1.bf16.msra.mxu1 %v968_v35  ;;  %v980_v21 = vld [vmem:[%s1195_s3 + $0xa8] sm:$0xff]   ;;  %v982_v23 = vld [vmem:[%s1195_s3 + $0xb8] sm:$0xff]  }
  0x1c   : > { %580 = vmatprep.subr.bf16.mxu0 %v995_v0  ;;  %482 = vmatprep.subr.bf16.mxu1 %v995_v0 }
  0x1d   : > { %v283_v28 = vor.u32 %v281_v22, %v280_v25  ;;  %v284_v29 = vrot.slane %v280_v25, 4  ;;  %v293_v30 = vrot.slane %v288_v26, 4  ;;  %v291_v31 = vor.u32 %v289_v24, %v288_v26  ;;  %v981_v22 = vld [vmem:[%s1195_s3 + $0xb0] sm:$0xff]   ;;  %v983_v24 = vld [vmem:[%s1195_s3 + $0xc0] sm:$0xff]   ;;  %v984_v25 = vld [vmem:[%s1195_s3 + $0xc8] sm:$0xff]  }
  0x1f   : > { %294 = vrot.lane.b32.xlu0 %v283_v28, %s996_s26  ;;  %298 = vrot.lane.b32.xlu1 %v293_v30, %s996_s26  ;;  %v292_v33 = vsel %vm276_vm8, %v284_v29, %v291_v31  ;;  %vm466_vm8 = vcmask 130048  }
  0x20   : > { %581 = vmatpush1.bf16.msra.mxu0 %v967_v36  ;;  %483 = vmatpush1.bf16.msra.mxu1 %v970_v37 }
  0x21   : > { %582 = vmatprep.subr.bf16.mxu0 %v995_v0  ;;  %484 = vmatprep.subr.bf16.mxu1 %v995_v0 }
  0x23   : > { %296 = vrot.lane.b32.xlu0 %v292_v33, %s996_s26 }
  0x24   : > { %583 = vmatpush1.bf16.msra.mxu0 %v969_v38  ;;  %485 = vmatpush1.bf16.msra.mxu1 %v972_v39 }
  0x25   : > { %584 = vmatprep.subr.bf16.mxu0 %v995_v0  ;;  %486 = vmatprep.subr.bf16.mxu1 %v995_v0 }
  0x28   : > { %585 = vmatpush1.bf16.msra.mxu0 %v971_v40  ;;  %487 = vmatpush1.bf16.msra.mxu1 %v976_v41 }
  0x29   : > { %699 = vmatprep.subr.bf16.mxu0 %v995_v0 }
  0x91   : > { %v295_v43 = vpop.permute.xlu0 %294  ;;  %v299_v44 = vpop.permute.xlu1 %298 }
  0x92   : > { %v300_v46 = vrot.slane %v295_v43, 4  ;;  %v302_v48 = vrot.slane %v299_v44, 4 }
  0x94   : > { %v304_v49 = vsel %vm303_vm4, %v300_v46, %v295_v43  ;;  %v306_v50 = vsel %vm303_vm4, %v302_v48, %v299_v44 }
  0x95   : > { %v318_v51 = vsel %vm316_vm5, %v304_v49, %v317_v45  ;;  %v331_v52 = vsel %vm329_vm7, %v306_v50, %v330_v47  ;;  %v297_v53 = vpop.permute.xlu0 %296 }
  0x96   : > { %319 = vst [vmem:[#allocation2] sm:$0xff] %v318_v51  ;;  %332 = vst [vmem:[#allocation2 + $0x10] sm:$0x11] %v331_v52  ;;  %v301_v54 = vrot.slane %v297_v53, 4 }
  0x98   : > { %v305_v55 = vsel %vm303_vm4, %v301_v54, %v297_v53 }
  0x99   : > { %323 = vst.msk [vmem:[#allocation2 + $0x8] sm:$0xff] %vm322_vm6, %v305_v55 }
  0x9d   : > { %v353_v56 = vld [vmem:[#allocation2 + $0x10] sm:$0x11]  ;;  %v609_v60 = vld [vmem:[#allocation2] sm:$0xee] }
  0x9e   : > { %v883_v57 = vcombine.high %v353_v56, %v353_v56  ;;  %v882_v58 = vcombine.low %v353_v56, %v353_v56 }
  0xa0   : > { %v334_v59 = vld [vmem:[#allocation2 + $0x8] sm:$0xff]  ;;  %v407_v61 = vshll.u32 %v883_v57, 16  ;;  %v395_v62 = vshll.u32 %v882_v58, 16  ;;  %v639_v4 = vrot.slane %v883_v57, 1  ;;  %v636_v29 = vrot.slane %v882_v58, 1 }
  0xa1   : > { %v881_v63 = vcombine.high %v318_v51, %v334_v59  ;;  %v880_v1 = vcombine.low %v318_v51, %v334_v59  ;;  %v923_v3 = vcombine.high %v609_v60, %v334_v59  ;;  %v922_v26 = vcombine.low %v609_v60, %v334_v59 }
  0xa2   : > { %v409_v9 = vrot.slane %v407_v61, 1  ;;  %v397_v10 = vrot.slane %v395_v62, 1 }
  0xa3   : > { %903 = vmatprep.mubr.msk.bf16.mxu0 %vm466_vm8, %v881_v63  ;;  %v390_v5 = vshll.u32 %v880_v1, 16  ;;  %v638_v6 = vrot.slane %v923_v3, 1  ;;  %v402_v7 = vshll.u32 %v881_v63, 16  ;;  %v400_v8 = vshrl.u32 %v881_v63, 16 }
  0xa4   : > { %601 = vmatmul.mubr.bf16.vlgmr.msra.gmra.mrb[0].mxu0 %v880_v1  ;;  %v388_v14 = vshrl.u32 %v880_v1, 16  ;;  %v635_v28 = vrot.slane %v922_v26, 1 }
  0xa5   : > { %700 = vmatpush1.bf16.msra.mxu0 %v973_v2  ;;  %v640_v11 = vsel %vm634_vm9, %v638_v6, %v639_v4  ;;  %v404_v13 = vrot.slane %v402_v7, 1  ;;  %v392_v15 = vrot.slane %v390_v5, 1 }
  0xa6   : > { %933 = vmatprep.mubr.msk.bf16.mxu0 %vm466_vm8, %v640_v11  ;;  %701 = vmatprep.subr.bf16.mxu0 %v995_v0  ;;  %v637_v30 = vsel %vm634_vm9, %v635_v28, %v636_v29 }
  0xa7   : > { %v405_v16 = vor.u32 %v404_v13, %v400_v8  ;;  %v393_v17 = vor.u32 %v392_v15, %v388_v14 }
  0xa9   : > { %702 = vmatpush1.bf16.msra.mxu0 %v977_v12  ;;  %v410_v18 = vsel %vm386_vm10, %v405_v16, %v409_v9  ;;  %v398_v19 = vsel %vm386_vm10, %v393_v17, %v397_v10 }
  0xaa   : > { %893 = vmatprep.mubr.msk.bf16.mxu1 %vm466_vm8, %v410_v18  ;;  %703 = vmatprep.subr.bf16.mxu0 %v995_v0 }
  0xab   : > { %503 = vmatmul.mubr.bf16.vlgmr.msra.gmra.mrb[0].mxu1 %v398_v19 }
  0xad   : > { %704 = vmatpush1.bf16.msra.mxu0 %v979_v20 }
  0xae   : > { %705 = vmatprep.subr.bf16.mxu0 %v995_v0 }
  0xb1   : > { %706 = vmatpush1.bf16.msra.mxu0 %v980_v21 }
  0xb2   : > { %707 = vmatprep.subr.bf16.mxu0 %v995_v0 }
  0xb5   : > { %708 = vmatpush1.bf16.msra.mxu0 %v981_v22 }
  0xb6   : > { %709 = vmatprep.subr.bf16.mxu0 %v995_v0 }
  0xb9   : > { %710 = vmatpush1.bf16.msra.mxu0 %v982_v23 }
  0xba   : > { %711 = vmatprep.subr.bf16.mxu0 %v995_v0 }
  0xbd   : > { %712 = vmatpush1.bf16.msra.mxu0 %v983_v24 }
  0xbe   : > { %713 = vmatprep.subr.bf16.mxu0 %v995_v0 }
  0xc1   : > { %714 = vmatpush1.bf16.msra.mxu0 %v984_v25 }
  0xc2   : > { %715 = vmatprep.subr.bf16.mxu0 %v995_v0 }
  0xc5   : > { %716 = vmatpush1.bf16.msra.mxu0 %v985_v27 }
  0xc8   : > { %732 = vmatmul.mubr.bf16.vlgmr.msra.gmra.mrb[0].mxu0 %v637_v30 }
 0x17e   : > { %v504_v31 = vpop.f32.mrb[0].mxu1 }
 0x17f   : > { %v506_v32 = vpop.f32.mrb[1].mxu1 }
 0x180   : > { %v507_v33 = vpop.f32.mrb[2].mxu1 }
 0x181   : > { %v509_v34 = vpop.f32.mrb[3].mxu1 }
 0x19b   : > { %v733_v35 = vpop.f32.mrb[0].mxu0 }
 0x19c   : > { %v940_v36 = vadd.f32 %v733_v35, %v504_v31  ;;  %v735_v37 = vpop.f32.mrb[1].mxu0 }
 0x19d   : > { %v736_v0 = vpop.f32.mrb[2].mxu0 }
 0x19e   : > { %760 = vst [vmem:[%s231_s16] sm:$0xff] %v940_v36  ;;  %v941_v38 = vadd.f32 %v736_v0, %v507_v33  ;;  %v738_v39 = vpop.f32.mrb[3].mxu0  ;;  %v750_v40 = vmul.f32 %v940_v36, %v940_v36 }
 0x1a0   : > { %v742_v41 = vadd.f32 %v941_v38, %v940_v36  ;;  %v751_v42 = vmul.f32 %v941_v38, %v941_v38  ;;  %761 = vst [vmem:[%s231_s16 + $0x8] sm:$0xff] %v941_v38 }
 0x1a2   : > { %v743_v43 = vrot.slane %v742_v41, 4  ;;  %v752_v44 = vadd.f32 %v751_v42, %v750_v40 }
 0x1a4   : > { %v744_v45 = vadd.f32 %v743_v43, %v742_v41  ;;  %v753_v46 = vrot.slane %v752_v44, 4 }
 0x1a6   : > { %v745_v47 = vrot.slane %v744_v45, 2  ;;  %v754_v48 = vadd.f32 %v753_v46, %v752_v44 }
 0x1a8   : > { %v746_v49 = vadd.f32 %v745_v47, %v744_v45  ;;  %v755_v50 = vrot.slane %v754_v48, 2 }
 0x1aa   : > { %v747_v51 = vrot.slane %v746_v49, 1  ;;  %v756_v52 = vadd.f32 %v755_v50, %v754_v48 }
 0x1ac   : > { %v748_v53 = vadd.f32 %v747_v51, %v746_v49  ;;  %v757_v54 = vrot.slane %v756_v52, 1 }
 0x1ae   : > { %749 = vst [vmem:[%s235_s21] sm:$0x1] %v748_v53  ;;  %v758_v55 = vadd.f32 %v757_v54, %v756_v52 }
 0x1b0   : > { %759 = vst [vmem:[%s235_s21 + $0x1] sm:$0x1] %v758_v55 }
 0x1b1 PF: > { %s16_s18 = sadd.s32 1, %s993_s18  }
 0x1b2   : > { %p13_p4 = scmp.ge.s32.totalorder %s16_s18, 4  }
 0x1b4   :  { %15 = sbr.rel (!%p13_p4) target bundleno = 1 (0x1), region = 80 }

</bundles_post_ra>
